<compile_context>
chip_gen: v6e
topology: v6e:2x2x1
jax: 0.10.0
libtpu: 0.0.40
codegen_flags: <defaults>
</compile_context>

<pallas_src>
import jax
import jax.numpy as jnp
from jax.experimental import pallas as pl
from jax.experimental.pallas import tpu as pltpu


def _pwconv_kernel(w_ref, x_ref, o_ref):
    # w_ref: (C_in, C_out) transposed conv weight, VMEM-resident across grid.
    # x_ref: (TM, C_in) row tile;  o_ref: (TM, C_out) row tile.
    o_ref[...] = jnp.dot(
        x_ref[...], w_ref[...], preferred_element_type=jnp.float32
    ).astype(o_ref.dtype)


def _round_up(v: int, m: int) -> int:
    return ((v + m - 1) // m) * m


def pwconv_forward(x, weight, H=None, W=None, D=None, *, tm=4096, io_dtype=None):
    """PWConv forward.

    x:        (B, N, C_in) with N = H*W*D (H/W/D only sanity-checked: a 1x1x1
              conv never sees the spatial layout).
    weight:   (C_out, C_in, 1, 1, 1) or (C_out, C_in) Conv3d weight (bias-free).
    tm:       row-tile size (rows of the flattened (B*N, C) matrix); auto-capped
              to fit VMEM and auto-shrunk for small inputs.
    io_dtype: optional I/O dtype override (e.g. jnp.bfloat16 to halve HBM
              traffic); accumulation is always f32 on the MXU.
    """
    B, N, C_in = x.shape
    if H is not None and W is not None and D is not None:
        assert H * W * D == N, "H*W*D must equal N"
    w = weight.reshape(weight.shape[0], weight.shape[1])        # (C_out, C_in)
    C_out = w.shape[0]

    compute_dtype = jnp.dtype(io_dtype) if io_dtype is not None else jnp.dtype(x.dtype)
    itemsize = compute_dtype.itemsize

    M = B * N
    x2 = x.reshape(M, C_in).astype(compute_dtype)
    # NOTE: weight is cast to the I/O dtype (bf16 if io_dtype=bf16) — a
    # documented mixed-precision deviation from PyTorch's f32 weights.
    w_t = jnp.asarray(w.T, dtype=compute_dtype)                  # (C_in, C_out)

    # --- row-tile selection -------------------------------------------------
    # Cap tm so double-buffered in + out tiles stay within a conservative VMEM
    # budget (holds on v5e's 16 MiB scoped default once raised explicitly,
    # v6e's 128 MiB, and v7x's 64 MiB physical VMEM).
    VMEM_TILE_BUDGET = 24 * 1024 * 1024
    max_tm = VMEM_TILE_BUDGET // (2 * (C_in + C_out) * itemsize)
    tm = max(8, min(tm, (max_tm // 8) * 8))

    if M <= tm:
        if M >= 1024:
            # Split into ≥2 grid steps so the "parallel" row axis can shard
            # across v7x's two TensorCores.
            tm_eff = _round_up(-(-M // 2), 8)
        else:
            tm_eff = M            # single full-extent block (always legal)
    else:
        tm_eff = (tm // 8) * 8
    grid_m = pl.cdiv(M, tm_eff)   # ragged last block handled by Pallas

    tile_bytes = (
        2 * tm_eff * (C_in + C_out) * itemsize     # double-buffered in + out
        + 2 * C_in * C_out * itemsize              # resident weight block
    )
    vmem_limit = min(int(tile_bytes * 1.5) + (2 << 20), 48 * 1024 * 1024)

    out = pl.pallas_call(
        _pwconv_kernel,
        out_shape=jax.ShapeDtypeStruct((M, C_out), compute_dtype),
        grid_spec=pltpu.PrefetchScalarGridSpec(
            num_scalar_prefetch=0,
            grid=(grid_m,),
            in_specs=[
                pl.BlockSpec((C_in, C_out), lambda i: (0, 0)),    # weight (resident)
                pl.BlockSpec((tm_eff, C_in), lambda i: (i, 0)),   # row tile
            ],
            out_specs=pl.BlockSpec((tm_eff, C_out), lambda i: (i, 0)),
        ),
        compiler_params=pltpu.CompilerParams(
            dimension_semantics=("parallel",),
            vmem_limit_bytes=vmem_limit,
        ),
        cost_estimate=pl.CostEstimate(
            flops=2 * M * C_in * C_out,
            transcendentals=0,
            bytes_accessed=M * C_in * itemsize
            + M * C_out * itemsize
            + C_in * C_out * itemsize,
        ),
    )(w_t, x2)

    return out.reshape(B, N, C_out)


def _reference_forward(x, weight):
    """Pure-JAX reference matching the PyTorch module (1x1x1 conv == matmul)."""
    w = weight.reshape(weight.shape[0], weight.shape[1])        # (C_out, C_in)
    return jnp.einsum("bnc,oc->bno", x, w)


if __name__ == "__main__":
    B = 2
    C = 128            # module default dim=128 -> lane-dense channel axis
    H = W = D = 8
    N = H * W * D      # 512; flattened rows M = 1024 -> 2 grid steps of 512

    key = jax.random.PRNGKey(0)
    kx, kw = jax.random.split(key)
    x = jax.random.normal(kx, (B, N, C), dtype=jnp.float32)
    # Conv3d(dim, dim, 1, 1, 0, bias=False) weight: (C_out, C_in, 1, 1, 1).
    weight = jax.random.normal(kw, (C, C, 1, 1, 1), dtype=jnp.float32) * (C ** -0.5)

    out = pwconv_forward(x, weight, H, W, D)
    out = jax.block_until_ready(out)

    ref = _reference_forward(x, weight)
    assert out.shape == (B, N, C)
    assert jnp.allclose(out, ref, atol=1e-3, rtol=1e-3), "mismatch vs reference"

    print("KERNEL_OK")
</pallas_src>

<mosaic_0001>
module attributes {stable_mosaic.version = 11 : i64} {
  func.func @_pwconv_kernel(%arg0: i32, %arg1: memref<128x128xf32, #tpu.memory_space<vmem>>, %arg2: memref<512x128xf32, #tpu.memory_space<vmem>>, %arg3: memref<512x128xf32, #tpu.memory_space<vmem>>) attributes {dimension_semantics = [#tpu.dimension_semantics<parallel>], iteration_bounds = array<i64: 2>, scalar_prefetch = 0 : i64, scratch_operands = 0 : i64, tpu.core_type = #tpu.core_type<tc>, window_params = [{pipeline_mode = #tpu.pipeline_mode<synchronous>, transform_indices = @transform_0, window_bounds = array<i64: 128, 128>}, {transform_indices = @transform_1, window_bounds = array<i64: 512, 128>}, {transform_indices = @transform_2, window_bounds = array<i64: 512, 128>}]} {
    %c0 = arith.constant 0 : index
    %c0_0 = arith.constant 0 : index
    %0 = vector.load %arg2[%c0, %c0_0] : memref<512x128xf32, #tpu.memory_space<vmem>>, vector<512x128xf32>
    %c0_1 = arith.constant 0 : index
    %c0_2 = arith.constant 0 : index
    %1 = vector.load %arg1[%c0_1, %c0_2] : memref<128x128xf32, #tpu.memory_space<vmem>>, vector<128x128xf32>
    %cst = arith.constant dense<0.000000e+00> : vector<512x128xf32>
    %2 = tpu.matmul %0, %1, %cst {dimension_numbers = #tpu.dot_dimension_numbers<[1], [0], [0], [1], [0, 0, 1, 1], [], []>} : vector<512x128xf32>, vector<128x128xf32>, vector<512x128xf32> -> vector<512x128xf32>
    %c0_3 = arith.constant 0 : index
    %c0_4 = arith.constant 0 : index
    %3 = vector.load %arg3[%c0_3, %c0_4] : memref<512x128xf32, #tpu.memory_space<vmem>>, vector<512x128xf32>
    tpu.vector_store %arg3[%c0_3, %c0_4], %2 {strides = array<i32>} : memref<512x128xf32, #tpu.memory_space<vmem>>, vector<512x128xf32>,
    return
  }
  func.func @transform_0(%arg0: i32) -> (i32, i32) {
    %c0_i32 = arith.constant 0 : i32
    %c0_i32_0 = arith.constant 0 : i32
    %c0_i32_1 = arith.constant 0 : i32
    return %c0_i32, %c0_i32_0 : i32, i32
  }
  func.func @transform_1(%arg0: i32) -> (i32, i32) {
    %c0_i32 = arith.constant 0 : i32
    %c0_i32_0 = arith.constant 0 : i32
    return %arg0, %c0_i32 : i32, i32
  }
  func.func @transform_2(%arg0: i32) -> (i32, i32) {
    %c0_i32 = arith.constant 0 : i32
    %c0_i32_0 = arith.constant 0 : i32
    return %arg0, %c0_i32 : i32, i32
  }
}

</mosaic_0001>

<bundles_post_ra>
// kernel: tpu_custom_call.1
= control target key start
LH: loop header
LB: loop body
LE: loop exit
PB: predicated region body
PF: predicated region fallthrough
CT: control target
= control target key end

     0   :  { %7 = vsyncpa [#allocation3], 0  ;;  %s1592_s0 = inlined_call_operand.hbm [shape: f32[128,128], index: 0, kind: input, shape index: {}]   ;;  %s1593_s1 = inlined_call_operand.hbm [shape: f32[1024,128], index: 1, kind: input, shape index: {}]   ;;  %s1594_s2 = inlined_call_operand.hbm [shape: f32[1024,128], index: 2, kind: output, shape index: {}]  }
   0x1   :  { %8 = vsyncpa [#allocation6], 0 }
   0x2   :  { %10 = vsyncpa [#allocation6 + $0x1], 0 }
   0x3   :  { %11 = vsyncpa [#allocation4], 0 }
   0x4   :  { %13 = vsyncpa [#allocation4 + $0x1], 0  ;;  %s1272_s9 = smov 0   ;;  %s1274_s10 = smov 0  }
   0x5   :  { %s1276_s11 = smov 0   ;;  %s1278_s12 = smov 0  }
   0x6 LB: > { %s1293_s13 = sadd.s32 4294967295, %s1248_s12   ;;  %s807_s14 = sadd.s32 4294967294, %s1248_s12   ;;  %s1248_s12 = sphi %s1278_s12, %s1616_s12   ;;  %s1244_s11 = sphi %s1276_s11, %s1615_s11   ;;  %s1240_s10 = sphi %s1274_s10, %s1614_s10   ;;  %s1236_s9 = sphi %s1272_s9, %s1613_s9  }
   0x7   : > { %p60_p0 = scmp.ne.s32.totalorder %s1240_s10, %s1236_s9  ;;  %p1595_p1 = scmp.eq.s32.totalorder %s1293_s13, 0 }
   0x8   : > { %p90_p3 = scmp.eq.s32.totalorder %s807_s14, 1  ;;  %p808_p5 = scmp.ge.s32.totalorder %s1248_s12, 1 }
   0x9   : > { %p1302_p4 = por %p1595_p1, %p60_p0  ;;  %p97_p7 = scmp.lt.s32.totalorder %s1248_s12, 3 }
   0xa   : > { %p1307_p6 = por %p90_p3, %p60_p0  ;;  %s1250_s18 = smov [#allocation2]  }
   0xb   : > { %s1599_s15 = scalar_select %p1302_p4, 1, 0 }
   0xc   : > { %s1600_s16 = scalar_select %p1307_p6, 1, 0 }
   0xd   : > { %p1312_p8 = pnand %p808_p5, %p97_p7  ;;  %s109_s19 = sshll.u32 %s1250_s18, 4  ;;  %s110_s19 = int_to_ptr.vmem [resolvable:$true] %s109_s19 }
   0xe   : > { %s1326_s21 = sadd.s32 1, %s1248_s12   ;;  %s47_s22 = sadd.s32 1, %s1244_s11 }
   0xf   : > { %s1601_s17 = scalar_select %p1312_p8, 1, 0 }
  0x10   : > { %p1073_p9 = pneg %p1312_p8  ;;  %s44_s23 = ssub.s32 %s1248_s12, %s1326_s21 }
  0x11   : > { %s1137_s24 = scalar_lea.vmem %s110_s19, 2048  ;;  %p1145_p5 = scmp.lt.s32.totalorder %s110_s19, %s110_s19 }
  0x12   : > { %p1321_p11 = pnand %p1073_p9, %p1595_p1  ;;  %p1138_p13 = scmp.ne.s32.totalorder %s110_s19, %s1137_s24 }
  0x13   : > { %p1146_p7 = scmp.lt.s32.totalorder %s1137_s24, %s1137_s24 }
  0x14   : > { %p1128_p12 = pneg %p1321_p11 }
  0x15   : > { %p1147_p10 = por %p1146_p7, %p1145_p5 }
  0x16   : > { %p1140_p0 = pnand %p1138_p13, %p1128_p12 }
  0x18   : > { %p1141_p3 = pneg %p1140_p0 }
  0x1a   : > { %p1148_p2 = pnand %p1147_p10, %p1141_p3 }
  0x1c   : > { %1151 = shalt.err (!%p1148_p2)
}
  0x1d   : > { %s1251_s25 = smov 128   ;;  %s1252_s26 = smov 8  }
  0x1e   : > { %1076 = dma.hbm_to_vmem [thread:$0]  (!%p1321_p11), %s1592_s0, 2048, %s110_s19, [#allocation3], %s1251_s25, %s1251_s25, %s1252_s26  }
  0x1f   : > { %p45_p2 = scmp.eq.s32.totalorder %s44_s23, 0  ;;  %p54_p9 = scmp.ne.s32.totalorder %s1244_s11, %s1240_s10 }
  0x20   : > { %p55_p10 = scmp.eq.s32.totalorder %s1248_s12, 0  ;;  %p1086_p12 = scmp.lt.s32.totalorder %s1248_s12, 2 }
  0x21   : > { %s1346_s29 = scalar_select %p45_p2, %s1244_s11, %s47_s22  }
  0x22   : > { %p56_p13 = por %p55_p10, %p54_p9  ;;  %p1603_p0 = scmp.eq.s32.totalorder %s1293_s13, 1 }
  0x23   : > { %s123_s3 = sand.u32 1, %s1244_s11   ;;  %s823_s4 = sshll.u32 %s1248_s12, 13 }
  0x24   : > { %p1350_p3 = por %p1603_p0, %p54_p9  ;;  %s811_s5 = sshll.u32 %s123_s3, 9 }
  0x25   : > { %s1359_s8 = scalar_lea.hbm %s1593_s1, %s823_s4  ;;  %s127_s14 = scalar_lea.vmem [#allocation5], %s811_s5 }
  0x26   : > { %s1604_s30 = scalar_select %p1350_p3, 1, 0 }
  0x27   : > { %s134_s18 = sshll.u32 %s127_s14, 4  ;;  %p1361_p11 = pnand %p1086_p12, %p56_p13  ;;  %s1365_s18 = int_to_ptr.vmem [resolvable:$true] %s134_s18 }
  0x28   : > { %s1367_s20 = scalar_lea.sflag [#allocation6], %s123_s3  ;;  %s1152_s22 = scalar_lea.hbm %s1359_s8, 8192 }
  0x29   : > { %p1153_p5 = scmp.ne.s32.totalorder %s1359_s8, %s1152_s22  ;;  %p1154_p7 = pneg %p1361_p11 }
  0x2a   : > { %s1157_s27 = scalar_lea.hbm %s1593_s1, 16384  ;;  %p1158_p10 = scmp.lt.s32.totalorder %s1359_s8, %s1593_s1 }
  0x2b   : > { %p1155_p2 = pnand %p1154_p7, %p1153_p5  ;;  %p1159_p12 = scmp.lt.s32.totalorder %s1157_s27, %s1152_s22 }
  0x2d   : > { %p1156_p9 = pneg %p1155_p2  ;;  %p1160_p13 = por %p1159_p12, %p1158_p10 }
  0x2f   : > { %p1161_p0 = pnand %p1160_p13, %p1156_p9 }
  0x31   : > { %1164 = shalt.err (!%p1161_p0)
}
  0x32   : > { %s1165_s3 = scalar_lea.vmem %s1365_s18, 8192  ;;  %s1253_s5 = smov [#allocation5]  }
  0x33   : > { %p1166_p1 = scmp.ne.s32.totalorder %s1365_s18, %s1165_s3  ;;  %s1170_s6 = sshll.u32 %s1253_s5, 4  ;;  %s1171_s6 = int_to_ptr.vmem [resolvable:$false] %s1170_s6 }
  0x34   : > { %s1172_s7 = scalar_lea.vmem %s1171_s6, 16384  ;;  %p1173_p2 = scmp.lt.s32.totalorder %s1365_s18, %s1171_s6 }
  0x35   : > { %p1168_p6 = pnand %p1166_p1, %p1154_p7  ;;  %p1174_p3 = scmp.lt.s32.totalorder %s1172_s7, %s1165_s3 }
  0x37   : > { %p1169_p5 = pneg %p1168_p6  ;;  %p1175_p4 = por %p1174_p3, %p1173_p2 }
  0x39   : > { %p1176_p8 = pnand %p1175_p4, %p1169_p5 }
  0x3b   : > { %1179 = shalt.err (!%p1176_p8)
}
  0x3c   : > { %1080 = dma.hbm_to_vmem [thread:$0]  (!%p1361_p11), %s1359_s8, 8192, %s1365_s18, %s1367_s20, %s1251_s25, %s1251_s25, %s1252_s26  }
  0x3d   : > { %p1606_p1 = scmp.ne.s32.totalorder %s1601_s17, 0 }
  0x3e   : > { %p1607_p6 = scmp.eq.s32.totalorder (!%p1606_p1), %s1293_s13, 0 }
  0x3f   : > { %146 = sbr.rel (%p1606_p1) target bundleno = 376 (0x178), region = 28 }
  0x44   : > { %1223 = dma.done.wait (%p1607_p6), [#allocation3], 2048   ;;  %p1608_p7 = pmov %p1607_p6 }
  0x45   : > { %s1398_s14 = sand.u32 1, %s1240_s10   ;;  %p1609_p4 = scmp.ne.s32.totalorder %s1599_s15, 0 }
  0x46   : > { %1225 = vsyncadd (%p1608_p7), [#allocation3], 4294965248  ;;  %s816_s19 = sshll.u32 %s1398_s14, 9  ;;  %s153_s22 = scalar_lea.sflag [#allocation6], %s1398_s14 }
  0x47   : > { %s1404_s25 = scalar_lea.vmem [#allocation5], %s816_s19 }
  0x48   : > { %1227 = dma.done.wait (%p1609_p4), %s153_s22, 8192  }
  0x49   : > { %1229 = vsyncadd (%p1609_p4), %s153_s22, 4294959104  ;;  %v258_v0 = vld [vmem:[#allocation2 + $0x78] sm:$0xff]  ;;  %v257_v1 = vld [vmem:[#allocation2 + $0x70] sm:$0xff]  ;;  %s1476_s15 = scalar_lea.vmem [#allocation7], %s816_s19  ;;  %s824_s17 = sshll.u32 %s1293_s13, 13 }
  0x4a   : > { %905 = vmatprep.subr.mxu0 %v258_v0  ;;  %1033 = vmatprep.subr.mxu1 %v258_v0  ;;  %v256_v2 = vld [vmem:[#allocation2 + $0x68] sm:$0xff]  ;;  %v255_v3 = vld [vmem:[#allocation2 + $0x60] sm:$0xff]  ;;  %v254_v4 = vld [vmem:[#allocation2 + $0x58] sm:$0xff]  ;;  %s722_s26 = sshll.u32 %s1476_s15, 4  ;;  %s1543_s20 = scalar_lea.hbm %s1594_s2, %s824_s17  ;;  %s1545_s26 = int_to_ptr.vmem [resolvable:$true] %s722_s26 }
  0x4b   : > { %906 = vmatpush3.msra.mxu0 %v258_v0  ;;  %1049 = vmatpush3.msra.mxu1 %v258_v0  ;;  %v253_v5 = vld [vmem:[#allocation2 + $0x50] sm:$0xff]  ;;  %v252_v6 = vld [vmem:[#allocation2 + $0x48] sm:$0xff]  ;;  %v251_v7 = vld [vmem:[#allocation2 + $0x40] sm:$0xff]  ;;  %s709_s13 = scalar_lea.sflag [#allocation4], %s1398_s14  ;;  %s1180_s23 = scalar_lea.vmem %s1545_s26, 8192 }
  0x4c   : > { %907 = vmatprep.subr.mxu0 %v257_v1  ;;  %1034 = vmatprep.subr.mxu1 %v257_v1  ;;  %v250_v8 = vld [vmem:[#allocation2 + $0x38] sm:$0xff]  ;;  %v249_v9 = vld [vmem:[#allocation2 + $0x30] sm:$0xff]  ;;  %v248_v10 = vld [vmem:[#allocation2 + $0x28] sm:$0xff]  ;;  %p1181_p8 = scmp.ne.s32.totalorder %s1545_s26, %s1180_s23  ;;  %p1610_p3 = scmp.ne.s32.totalorder %s1604_s30, 0 }
  0x4d   : > { %908 = vmatpush3.msra.mxu0 %v257_v1  ;;  %1050 = vmatpush3.msra.mxu1 %v257_v1  ;;  %v247_v11 = vld [vmem:[#allocation2 + $0x20] sm:$0xff]  ;;  %v246_v12 = vld [vmem:[#allocation2 + $0x18] sm:$0xff]  ;;  %v245_v13 = vld [vmem:[#allocation2 + $0x10] sm:$0xff]  ;;  %s1254_s24 = smov [#allocation7]  }
  0x4e   : > { %909 = vmatprep.subr.mxu0 %v256_v2  ;;  %1035 = vmatprep.subr.mxu1 %v256_v2  ;;  %v244_v14 = vld [vmem:[#allocation2 + $0x8] sm:$0xff]  ;;  %v243_v15 = vld [vmem:[#allocation2] sm:$0xff]  ;;  %v181_v20 = vld [vmem:[%s1404_s25 + $0x10] sm:$0xff]  ;;  %p1182_p11 = pnand %p1181_p8, %p1610_p3  ;;  %s1184_s27 = sshll.u32 %s1254_s24, 4  ;;  %s1185_s27 = int_to_ptr.vmem [resolvable:$false] %s1184_s27 }
  0x4f   : > { %910 = vmatpush3.msra.mxu0 %v256_v2  ;;  %1051 = vmatpush3.msra.mxu1 %v256_v2  ;;  %v179_v16 = vld [vmem:[%s1404_s25] sm:$0xff]  ;;  %v180_v18 = vld [vmem:[%s1404_s25 + $0x8] sm:$0xff]  ;;  %v213_v21 = vld [vmem:[%s1404_s25 + $0x110] sm:$0xff]  ;;  %s1186_s28 = scalar_lea.vmem %s1185_s27, 16384  ;;  %p1187_p10 = scmp.lt.s32.totalorder %s1545_s26, %s1185_s27 }
  0x50   : > { %911 = vmatprep.subr.mxu0 %v255_v3  ;;  %1036 = vmatprep.subr.mxu1 %v255_v3  ;;  %v211_v17 = vld [vmem:[%s1404_s25 + $0x100] sm:$0xff]  ;;  %v212_v19 = vld [vmem:[%s1404_s25 + $0x108] sm:$0xff]  ;;  %v182_v22 = vld [vmem:[%s1404_s25 + $0x18] sm:$0xff]  ;;  %p1183_p9 = pneg %p1182_p11  ;;  %p1188_p12 = scmp.lt.s32.totalorder %s1186_s28, %s1180_s23 }
  0x51   : > { %912 = vmatpush3.msra.mxu0 %v255_v3  ;;  %1052 = vmatpush3.msra.mxu1 %v255_v3  ;;  %v214_v23 = vld [vmem:[%s1404_s25 + $0x118] sm:$0xff]  ;;  %v183_v24 = vld [vmem:[%s1404_s25 + $0x20] sm:$0xff]  ;;  %v184_v26 = vld [vmem:[%s1404_s25 + $0x28] sm:$0xff] }
  0x52   : > { %913 = vmatprep.subr.mxu0 %v254_v4  ;;  %1037 = vmatprep.subr.mxu1 %v254_v4  ;;  %v215_v25 = vld [vmem:[%s1404_s25 + $0x120] sm:$0xff]  ;;  %v216_v27 = vld [vmem:[%s1404_s25 + $0x128] sm:$0xff]  ;;  %v185_v28 = vld [vmem:[%s1404_s25 + $0x30] sm:$0xff]  ;;  %p1189_p13 = por %p1188_p12, %p1187_p10 }
  0x53   : > { %914 = vmatpush3.msra.mxu0 %v254_v4  ;;  %1053 = vmatpush3.msra.mxu1 %v254_v4  ;;  %v217_v29 = vld [vmem:[%s1404_s25 + $0x130] sm:$0xff]  ;;  %v186_v30 = vld [vmem:[%s1404_s25 + $0x38] sm:$0xff]  ;;  %v187_v32 = vld [vmem:[%s1404_s25 + $0x40] sm:$0xff] }
  0x54   : > { %915 = vmatprep.subr.mxu0 %v253_v5  ;;  %1038 = vmatprep.subr.mxu1 %v253_v5  ;;  %v218_v31 = vld [vmem:[%s1404_s25 + $0x138] sm:$0xff]  ;;  %v219_v33 = vld [vmem:[%s1404_s25 + $0x140] sm:$0xff]  ;;  %v188_v34 = vld [vmem:[%s1404_s25 + $0x48] sm:$0xff]  ;;  %p1190_p0 = pnand %p1189_p13, %p1183_p9 }
  0x55   : > { %916 = vmatpush3.msra.mxu0 %v253_v5  ;;  %1054 = vmatpush3.msra.mxu1 %v253_v5  ;;  %v220_v35 = vld [vmem:[%s1404_s25 + $0x148] sm:$0xff]  ;;  %v189_v36 = vld [vmem:[%s1404_s25 + $0x50] sm:$0xff]  ;;  %v190_v38 = vld [vmem:[%s1404_s25 + $0x58] sm:$0xff] }
  0x56   : > { %917 = vmatprep.subr.mxu0 %v252_v6  ;;  %1039 = vmatprep.subr.mxu1 %v252_v6  ;;  %v221_v37 = vld [vmem:[%s1404_s25 + $0x150] sm:$0xff]  ;;  %v222_v39 = vld [vmem:[%s1404_s25 + $0x158] sm:$0xff]  ;;  %v191_v40 = vld [vmem:[%s1404_s25 + $0x60] sm:$0xff] }
  0x57   : > { %918 = vmatpush3.msra.mxu0 %v252_v6  ;;  %1055 = vmatpush3.msra.mxu1 %v252_v6  ;;  %v223_v41 = vld [vmem:[%s1404_s25 + $0x160] sm:$0xff]  ;;  %v192_v42 = vld [vmem:[%s1404_s25 + $0x68] sm:$0xff]  ;;  %v193_v44 = vld [vmem:[%s1404_s25 + $0x70] sm:$0xff] }
  0x58   : > { %919 = vmatprep.subr.mxu0 %v251_v7  ;;  %1040 = vmatprep.subr.mxu1 %v251_v7  ;;  %v224_v43 = vld [vmem:[%s1404_s25 + $0x168] sm:$0xff]  ;;  %v225_v45 = vld [vmem:[%s1404_s25 + $0x170] sm:$0xff]  ;;  %v194_v46 = vld [vmem:[%s1404_s25 + $0x78] sm:$0xff] }
  0x59   : > { %920 = vmatpush3.msra.mxu0 %v251_v7  ;;  %1056 = vmatpush3.msra.mxu1 %v251_v7  ;;  %v226_v47 = vld [vmem:[%s1404_s25 + $0x178] sm:$0xff]  ;;  %v195_v48 = vld [vmem:[%s1404_s25 + $0x80] sm:$0xff]  ;;  %v196_v50 = vld [vmem:[%s1404_s25 + $0x88] sm:$0xff] }
  0x5a   : > { %921 = vmatprep.subr.mxu0 %v250_v8  ;;  %1041 = vmatprep.subr.mxu1 %v250_v8  ;;  %v227_v49 = vld [vmem:[%s1404_s25 + $0x180] sm:$0xff]  ;;  %v228_v51 = vld [vmem:[%s1404_s25 + $0x188] sm:$0xff]  ;;  %v197_v52 = vld [vmem:[%s1404_s25 + $0x90] sm:$0xff] }
  0x5b   : > { %922 = vmatpush3.msra.mxu0 %v250_v8  ;;  %1057 = vmatpush3.msra.mxu1 %v250_v8  ;;  %v229_v53 = vld [vmem:[%s1404_s25 + $0x190] sm:$0xff]  ;;  %v198_v54 = vld [vmem:[%s1404_s25 + $0x98] sm:$0xff]  ;;  %v199_v56 = vld [vmem:[%s1404_s25 + $0xa0] sm:$0xff] }
  0x5c   : > { %923 = vmatprep.subr.mxu0 %v249_v9  ;;  %1042 = vmatprep.subr.mxu1 %v249_v9  ;;  %v230_v55 = vld [vmem:[%s1404_s25 + $0x198] sm:$0xff]  ;;  %v231_v57 = vld [vmem:[%s1404_s25 + $0x1a0] sm:$0xff]  ;;  %v200_v58 = vld [vmem:[%s1404_s25 + $0xa8] sm:$0xff] }
  0x5d   : > { %924 = vmatpush3.msra.mxu0 %v249_v9  ;;  %1058 = vmatpush3.msra.mxu1 %v249_v9  ;;  %v232_v59 = vld [vmem:[%s1404_s25 + $0x1a8] sm:$0xff]  ;;  %v201_v60 = vld [vmem:[%s1404_s25 + $0xb0] sm:$0xff]  ;;  %v202_v62 = vld [vmem:[%s1404_s25 + $0xb8] sm:$0xff] }
  0x5e   : > { %925 = vmatprep.subr.mxu0 %v248_v10  ;;  %1043 = vmatprep.subr.mxu1 %v248_v10  ;;  %v233_v61 = vld [vmem:[%s1404_s25 + $0x1b0] sm:$0xff]  ;;  %v234_v63 = vld [vmem:[%s1404_s25 + $0x1b8] sm:$0xff]  ;;  %v203_v0 = vld [vmem:[%s1404_s25 + $0xc0] sm:$0xff] }
  0x5f   : > { %926 = vmatpush3.msra.mxu0 %v248_v10  ;;  %1059 = vmatpush3.msra.mxu1 %v248_v10  ;;  %v235_v1 = vld [vmem:[%s1404_s25 + $0x1c0] sm:$0xff]  ;;  %v204_v2 = vld [vmem:[%s1404_s25 + $0xc8] sm:$0xff]  ;;  %v205_v4 = vld [vmem:[%s1404_s25 + $0xd0] sm:$0xff] }
  0x60   : > { %927 = vmatprep.subr.mxu0 %v247_v11  ;;  %1044 = vmatprep.subr.mxu1 %v247_v11  ;;  %v236_v3 = vld [vmem:[%s1404_s25 + $0x1c8] sm:$0xff]  ;;  %v237_v5 = vld [vmem:[%s1404_s25 + $0x1d0] sm:$0xff]  ;;  %v206_v6 = vld [vmem:[%s1404_s25 + $0xd8] sm:$0xff] }
  0x61   : > { %928 = vmatpush3.msra.mxu0 %v247_v11  ;;  %1060 = vmatpush3.msra.mxu1 %v247_v11  ;;  %v238_v7 = vld [vmem:[%s1404_s25 + $0x1d8] sm:$0xff]  ;;  %v207_v8 = vld [vmem:[%s1404_s25 + $0xe0] sm:$0xff]  ;;  %v208_v10 = vld [vmem:[%s1404_s25 + $0xe8] sm:$0xff] }
  0x62   : > { %929 = vmatprep.subr.mxu0 %v246_v12  ;;  %1045 = vmatprep.subr.mxu1 %v246_v12  ;;  %v239_v9 = vld [vmem:[%s1404_s25 + $0x1e0] sm:$0xff]  ;;  %v240_v11 = vld [vmem:[%s1404_s25 + $0x1e8] sm:$0xff] }
  0x63   : > { %930 = vmatpush3.msra.mxu0 %v246_v12  ;;  %1061 = vmatpush3.msra.mxu1 %v246_v12  ;;  %v209_v12 = vld [vmem:[%s1404_s25 + $0xf0] sm:$0xff] }
  0x64   : > { %931 = vmatprep.subr.mxu0 %v245_v13  ;;  %1046 = vmatprep.subr.mxu1 %v245_v13 }
  0x65   : > { %932 = vmatpush3.msra.mxu0 %v245_v13  ;;  %1062 = vmatpush3.msra.mxu1 %v245_v13  ;;  %v241_v13 = vld [vmem:[%s1404_s25 + $0x1f0] sm:$0xff] }
  0x66   : > { %933 = vmatprep.subr.mxu0 %v244_v14  ;;  %1047 = vmatprep.subr.mxu1 %v244_v14 }
  0x67   : > { %934 = vmatpush3.msra.mxu0 %v244_v14  ;;  %1063 = vmatpush3.msra.mxu1 %v244_v14  ;;  %v210_v14 = vld [vmem:[%s1404_s25 + $0xf8] sm:$0xff] }
  0x68   : > { %935 = vmatprep.subr.mxu0 %v243_v15  ;;  %1048 = vmatprep.subr.mxu1 %v243_v15 }
  0x69   : > { %936 = vmatpush3.msra.mxu0 %v243_v15  ;;  %1064 = vmatpush3.msra.mxu1 %v243_v15  ;;  %v242_v15 = vld [vmem:[%s1404_s25 + $0x1f8] sm:$0xff] }
  0x6a   : > { %937 = vmatprep.mubr.f32.mxu0 %v179_v16  ;;  %985 = vmatprep.mubr.f32.mxu1 %v211_v17 }
  0x6b   : > { %938 = vmatmul.mubr.f32.vlgmr.msra.gmra.mxu0 %v180_v18  ;;  %986 = vmatmul.mubr.f32.vlgmr.msra.gmra.mxu1 %v212_v19 }
  0x6c   : > { %940 = vmatprep.mubr.f32.mxu0 %v181_v20  ;;  %988 = vmatprep.mubr.f32.mxu1 %v213_v21 }
  0x6f   : > { %941 = vmatmul.mubr.f32.gmra.mxu0 %v182_v22  ;;  %989 = vmatmul.mubr.f32.gmra.mxu1 %v214_v23 }
  0x70   : > { %943 = vmatprep.mubr.f32.mxu0 %v183_v24  ;;  %991 = vmatprep.mubr.f32.mxu1 %v215_v25 }
  0x73   : > { %944 = vmatmul.mubr.f32.gmra.mxu0 %v184_v26  ;;  %992 = vmatmul.mubr.f32.gmra.mxu1 %v216_v27 }
  0x74   : > { %946 = vmatprep.mubr.f32.mxu0 %v185_v28  ;;  %994 = vmatprep.mubr.f32.mxu1 %v217_v29 }
  0x77   : > { %947 = vmatmul.mubr.f32.gmra.mxu0 %v186_v30  ;;  %995 = vmatmul.mubr.f32.gmra.mxu1 %v218_v31 }
  0x78   : > { %949 = vmatprep.mubr.f32.mxu0 %v187_v32  ;;  %997 = vmatprep.mubr.f32.mxu1 %v219_v33 }
  0x7b   : > { %950 = vmatmul.mubr.f32.gmra.mxu0 %v188_v34  ;;  %998 = vmatmul.mubr.f32.gmra.mxu1 %v220_v35 }
  0x7c   : > { %952 = vmatprep.mubr.f32.mxu0 %v189_v36  ;;  %1000 = vmatprep.mubr.f32.mxu1 %v221_v37 }
  0x7f   : > { %953 = vmatmul.mubr.f32.gmra.mxu0 %v190_v38  ;;  %1001 = vmatmul.mubr.f32.gmra.mxu1 %v222_v39 }
  0x80   : > { %955 = vmatprep.mubr.f32.mxu0 %v191_v40  ;;  %1003 = vmatprep.mubr.f32.mxu1 %v223_v41 }
  0x83   : > { %956 = vmatmul.mubr.f32.gmra.mxu0 %v192_v42  ;;  %1004 = vmatmul.mubr.f32.gmra.mxu1 %v224_v43 }
  0x84   : > { %958 = vmatprep.mubr.f32.mxu0 %v193_v44  ;;  %1006 = vmatprep.mubr.f32.mxu1 %v225_v45 }
  0x87   : > { %959 = vmatmul.mubr.f32.gmra.mxu0 %v194_v46  ;;  %1007 = vmatmul.mubr.f32.gmra.mxu1 %v226_v47 }
  0x88   : > { %961 = vmatprep.mubr.f32.mxu0 %v195_v48  ;;  %1009 = vmatprep.mubr.f32.mxu1 %v227_v49 }
  0x8b   : > { %962 = vmatmul.mubr.f32.gmra.mxu0 %v196_v50  ;;  %1010 = vmatmul.mubr.f32.gmra.mxu1 %v228_v51 }
  0x8c   : > { %964 = vmatprep.mubr.f32.mxu0 %v197_v52  ;;  %1012 = vmatprep.mubr.f32.mxu1 %v229_v53 }
  0x8f   : > { %965 = vmatmul.mubr.f32.gmra.mxu0 %v198_v54  ;;  %1013 = vmatmul.mubr.f32.gmra.mxu1 %v230_v55 }
  0x90   : > { %967 = vmatprep.mubr.f32.mxu0 %v199_v56  ;;  %1015 = vmatprep.mubr.f32.mxu1 %v231_v57 }
  0x93   : > { %968 = vmatmul.mubr.f32.gmra.mxu0 %v200_v58  ;;  %1016 = vmatmul.mubr.f32.gmra.mxu1 %v232_v59 }
  0x94   : > { %970 = vmatprep.mubr.f32.mxu0 %v201_v60  ;;  %1018 = vmatprep.mubr.f32.mxu1 %v233_v61 }
  0x97   : > { %971 = vmatmul.mubr.f32.gmra.mxu0 %v202_v62  ;;  %1019 = vmatmul.mubr.f32.gmra.mxu1 %v234_v63 }
  0x98   : > { %973 = vmatprep.mubr.f32.mxu0 %v203_v0  ;;  %1021 = vmatprep.mubr.f32.mxu1 %v235_v1 }
  0x9b   : > { %974 = vmatmul.mubr.f32.gmra.mxu0 %v204_v2  ;;  %1022 = vmatmul.mubr.f32.gmra.mxu1 %v236_v3 }
  0x9c   : > { %976 = vmatprep.mubr.f32.mxu0 %v205_v4  ;;  %1024 = vmatprep.mubr.f32.mxu1 %v237_v5 }
  0x9f   : > { %977 = vmatmul.mubr.f32.gmra.mxu0 %v206_v6  ;;  %1025 = vmatmul.mubr.f32.gmra.mxu1 %v238_v7 }
  0xa0   : > { %979 = vmatprep.mubr.f32.mxu0 %v207_v8  ;;  %1027 = vmatprep.mubr.f32.mxu1 %v239_v9 }
  0xa3   : > { %980 = vmatmul.mubr.f32.gmra.mxu0 %v208_v10  ;;  %1028 = vmatmul.mubr.f32.gmra.mxu1 %v240_v11 }
  0xa4   : > { %982 = vmatprep.mubr.f32.mxu0 %v209_v12  ;;  %1030 = vmatprep.mubr.f32.mxu1 %v241_v13 }
  0xa7   : > { %983 = vmatmul.mubr.f32.gmra.mxu0 %v210_v14  ;;  %1031 = vmatmul.mubr.f32.gmra.mxu1 %v242_v15 }
 0x12b   : > { %v939_v16 = vpop.f32.mrf.mxu0  ;;  %v987_v17 = vpop.f32.mrf.mxu1 }
 0x12c   : > { %645 = vst [vmem:[%s1476_s15 + $0x8] sm:$0xff] %v939_v16  ;;  %677 = vst [vmem:[%s1476_s15 + $0x108] sm:$0xff] %v987_v17 }
 0x12d   : > { %v325_v18 = vpop.f32.mrf.mxu0  ;;  %v485_v19 = vpop.f32.mrf.mxu1 }
 0x12e   : > { %644 = vst [vmem:[%s1476_s15] sm:$0xff] %v325_v18  ;;  %676 = vst [vmem:[%s1476_s15 + $0x100] sm:$0xff] %v485_v19 }
 0x12f   : > { %v942_v20 = vpop.f32.mrf.mxu0  ;;  %v990_v21 = vpop.f32.mrf.mxu1 }
 0x130   : > { %647 = vst [vmem:[%s1476_s15 + $0x18] sm:$0xff] %v942_v20  ;;  %679 = vst [vmem:[%s1476_s15 + $0x118] sm:$0xff] %v990_v21 }
 0x131   : > { %v335_v22 = vpop.f32.mrf.mxu0  ;;  %v495_v23 = vpop.f32.mrf.mxu1 }
 0x132   : > { %646 = vst [vmem:[%s1476_s15 + $0x10] sm:$0xff] %v335_v22  ;;  %678 = vst [vmem:[%s1476_s15 + $0x110] sm:$0xff] %v495_v23 }
 0x133   : > { %v945_v24 = vpop.f32.mrf.mxu0  ;;  %v993_v25 = vpop.f32.mrf.mxu1 }
 0x134   : > { %649 = vst [vmem:[%s1476_s15 + $0x28] sm:$0xff] %v945_v24  ;;  %681 = vst [vmem:[%s1476_s15 + $0x128] sm:$0xff] %v993_v25 }
 0x135   : > { %v345_v26 = vpop.f32.mrf.mxu0  ;;  %v505_v27 = vpop.f32.mrf.mxu1 }
 0x136   : > { %648 = vst [vmem:[%s1476_s15 + $0x20] sm:$0xff] %v345_v26  ;;  %680 = vst [vmem:[%s1476_s15 + $0x120] sm:$0xff] %v505_v27 }
 0x137   : > { %v948_v28 = vpop.f32.mrf.mxu0  ;;  %v996_v29 = vpop.f32.mrf.mxu1 }
 0x138   : > { %651 = vst [vmem:[%s1476_s15 + $0x38] sm:$0xff] %v948_v28  ;;  %683 = vst [vmem:[%s1476_s15 + $0x138] sm:$0xff] %v996_v29 }
 0x139   : > { %v355_v30 = vpop.f32.mrf.mxu0  ;;  %v515_v31 = vpop.f32.mrf.mxu1 }
 0x13a   : > { %650 = vst [vmem:[%s1476_s15 + $0x30] sm:$0xff] %v355_v30  ;;  %682 = vst [vmem:[%s1476_s15 + $0x130] sm:$0xff] %v515_v31 }
 0x13b   : > { %v951_v32 = vpop.f32.mrf.mxu0  ;;  %v999_v33 = vpop.f32.mrf.mxu1 }
 0x13c   : > { %653 = vst [vmem:[%s1476_s15 + $0x48] sm:$0xff] %v951_v32  ;;  %685 = vst [vmem:[%s1476_s15 + $0x148] sm:$0xff] %v999_v33 }
 0x13d   : > { %v365_v34 = vpop.f32.mrf.mxu0  ;;  %v525_v35 = vpop.f32.mrf.mxu1 }
 0x13e   : > { %652 = vst [vmem:[%s1476_s15 + $0x40] sm:$0xff] %v365_v34  ;;  %684 = vst [vmem:[%s1476_s15 + $0x140] sm:$0xff] %v525_v35 }
 0x13f   : > { %v954_v36 = vpop.f32.mrf.mxu0  ;;  %v1002_v37 = vpop.f32.mrf.mxu1 }
 0x140   : > { %655 = vst [vmem:[%s1476_s15 + $0x58] sm:$0xff] %v954_v36  ;;  %687 = vst [vmem:[%s1476_s15 + $0x158] sm:$0xff] %v1002_v37 }
 0x141   : > { %v375_v38 = vpop.f32.mrf.mxu0  ;;  %v535_v39 = vpop.f32.mrf.mxu1 }
 0x142   : > { %654 = vst [vmem:[%s1476_s15 + $0x50] sm:$0xff] %v375_v38  ;;  %686 = vst [vmem:[%s1476_s15 + $0x150] sm:$0xff] %v535_v39 }
 0x143   : > { %v957_v40 = vpop.f32.mrf.mxu0  ;;  %v1005_v41 = vpop.f32.mrf.mxu1 }
 0x144   : > { %657 = vst [vmem:[%s1476_s15 + $0x68] sm:$0xff] %v957_v40  ;;  %689 = vst [vmem:[%s1476_s15 + $0x168] sm:$0xff] %v1005_v41 }
 0x145   : > { %v385_v42 = vpop.f32.mrf.mxu0  ;;  %v545_v43 = vpop.f32.mrf.mxu1 }
 0x146   : > { %656 = vst [vmem:[%s1476_s15 + $0x60] sm:$0xff] %v385_v42  ;;  %688 = vst [vmem:[%s1476_s15 + $0x160] sm:$0xff] %v545_v43 }
 0x147   : > { %v960_v44 = vpop.f32.mrf.mxu0  ;;  %v1008_v45 = vpop.f32.mrf.mxu1 }
 0x148   : > { %659 = vst [vmem:[%s1476_s15 + $0x78] sm:$0xff] %v960_v44  ;;  %691 = vst [vmem:[%s1476_s15 + $0x178] sm:$0xff] %v1008_v45 }
 0x149   : > { %v395_v46 = vpop.f32.mrf.mxu0  ;;  %v555_v47 = vpop.f32.mrf.mxu1 }
 0x14a   : > { %658 = vst [vmem:[%s1476_s15 + $0x70] sm:$0xff] %v395_v46  ;;  %690 = vst [vmem:[%s1476_s15 + $0x170] sm:$0xff] %v555_v47 }
 0x14b   : > { %v963_v48 = vpop.f32.mrf.mxu0  ;;  %v1011_v49 = vpop.f32.mrf.mxu1 }
 0x14c   : > { %661 = vst [vmem:[%s1476_s15 + $0x88] sm:$0xff] %v963_v48  ;;  %693 = vst [vmem:[%s1476_s15 + $0x188] sm:$0xff] %v1011_v49 }
 0x14d   : > { %v405_v50 = vpop.f32.mrf.mxu0  ;;  %v565_v51 = vpop.f32.mrf.mxu1 }
 0x14e   : > { %660 = vst [vmem:[%s1476_s15 + $0x80] sm:$0xff] %v405_v50  ;;  %692 = vst [vmem:[%s1476_s15 + $0x180] sm:$0xff] %v565_v51 }
 0x14f   : > { %v966_v52 = vpop.f32.mrf.mxu0  ;;  %v1014_v53 = vpop.f32.mrf.mxu1 }
 0x150   : > { %663 = vst [vmem:[%s1476_s15 + $0x98] sm:$0xff] %v966_v52  ;;  %695 = vst [vmem:[%s1476_s15 + $0x198] sm:$0xff] %v1014_v53 }
 0x151   : > { %v415_v54 = vpop.f32.mrf.mxu0  ;;  %v575_v55 = vpop.f32.mrf.mxu1 }
 0x152   : > { %662 = vst [vmem:[%s1476_s15 + $0x90] sm:$0xff] %v415_v54  ;;  %694 = vst [vmem:[%s1476_s15 + $0x190] sm:$0xff] %v575_v55 }
 0x153   : > { %v969_v56 = vpop.f32.mrf.mxu0  ;;  %v1017_v57 = vpop.f32.mrf.mxu1 }
 0x154   : > { %665 = vst [vmem:[%s1476_s15 + $0xa8] sm:$0xff] %v969_v56  ;;  %697 = vst [vmem:[%s1476_s15 + $0x1a8] sm:$0xff] %v1017_v57 }
 0x155   : > { %v425_v58 = vpop.f32.mrf.mxu0  ;;  %v585_v59 = vpop.f32.mrf.mxu1 }
 0x156   : > { %664 = vst [vmem:[%s1476_s15 + $0xa0] sm:$0xff] %v425_v58  ;;  %696 = vst [vmem:[%s1476_s15 + $0x1a0] sm:$0xff] %v585_v59 }
 0x157   : > { %v972_v60 = vpop.f32.mrf.mxu0  ;;  %v1020_v61 = vpop.f32.mrf.mxu1 }
 0x158   : > { %667 = vst [vmem:[%s1476_s15 + $0xb8] sm:$0xff] %v972_v60  ;;  %699 = vst [vmem:[%s1476_s15 + $0x1b8] sm:$0xff] %v1020_v61 }
 0x159   : > { %v435_v62 = vpop.f32.mrf.mxu0  ;;  %v595_v63 = vpop.f32.mrf.mxu1 }
 0x15a   : > { %666 = vst [vmem:[%s1476_s15 + $0xb0] sm:$0xff] %v435_v62  ;;  %698 = vst [vmem:[%s1476_s15 + $0x1b0] sm:$0xff] %v595_v63 }
 0x15b   : > { %v975_v0 = vpop.f32.mrf.mxu0  ;;  %v1023_v1 = vpop.f32.mrf.mxu1 }
 0x15c   : > { %669 = vst [vmem:[%s1476_s15 + $0xc8] sm:$0xff] %v975_v0  ;;  %701 = vst [vmem:[%s1476_s15 + $0x1c8] sm:$0xff] %v1023_v1 }
 0x15d   : > { %v445_v2 = vpop.f32.mrf.mxu0  ;;  %v605_v3 = vpop.f32.mrf.mxu1 }
 0x15e   : > { %668 = vst [vmem:[%s1476_s15 + $0xc0] sm:$0xff] %v445_v2  ;;  %700 = vst [vmem:[%s1476_s15 + $0x1c0] sm:$0xff] %v605_v3 }
 0x15f   : > { %v978_v4 = vpop.f32.mrf.mxu0  ;;  %v1026_v5 = vpop.f32.mrf.mxu1 }
 0x160   : > { %671 = vst [vmem:[%s1476_s15 + $0xd8] sm:$0xff] %v978_v4  ;;  %703 = vst [vmem:[%s1476_s15 + $0x1d8] sm:$0xff] %v1026_v5 }
 0x161   : > { %v455_v6 = vpop.f32.mrf.mxu0  ;;  %v615_v7 = vpop.f32.mrf.mxu1 }
 0x162   : > { %670 = vst [vmem:[%s1476_s15 + $0xd0] sm:$0xff] %v455_v6  ;;  %702 = vst [vmem:[%s1476_s15 + $0x1d0] sm:$0xff] %v615_v7 }
 0x163   : > { %v981_v8 = vpop.f32.mrf.mxu0  ;;  %v1029_v9 = vpop.f32.mrf.mxu1 }
 0x164   : > { %673 = vst [vmem:[%s1476_s15 + $0xe8] sm:$0xff] %v981_v8  ;;  %705 = vst [vmem:[%s1476_s15 + $0x1e8] sm:$0xff] %v1029_v9 }
 0x165   : > { %v465_v10 = vpop.f32.mrf.mxu0  ;;  %v625_v11 = vpop.f32.mrf.mxu1 }
 0x166   : > { %672 = vst [vmem:[%s1476_s15 + $0xe0] sm:$0xff] %v465_v10  ;;  %704 = vst [vmem:[%s1476_s15 + $0x1e0] sm:$0xff] %v625_v11 }
 0x167   : > { %v984_v12 = vpop.f32.mrf.mxu0  ;;  %v1032_v13 = vpop.f32.mrf.mxu1 }
 0x168   : > { %675 = vst [vmem:[%s1476_s15 + $0xf8] sm:$0xff] %v984_v12  ;;  %707 = vst [vmem:[%s1476_s15 + $0x1f8] sm:$0xff] %v1032_v13 }
 0x169   : > { %v475_v14 = vpop.f32.mrf.mxu0  ;;  %v635_v15 = vpop.f32.mrf.mxu1 }
 0x16a   : > { %674 = vst [vmem:[%s1476_s15 + $0xf0] sm:$0xff] %v475_v14  ;;  %706 = vst [vmem:[%s1476_s15 + $0x1f0] sm:$0xff] %v635_v15 }
 0x16b   : > { %1193 = shalt.err (!%p1190_p0)
}
 0x16c   : > { %s1194_s4 = scalar_lea.hbm %s1543_s20, 8192  ;;  %s1198_s6 = scalar_lea.hbm %s1594_s2, 16384 }
 0x16d   : > { %p1195_p5 = scmp.ne.s32.totalorder %s1543_s20, %s1194_s4  ;;  %p1199_p6 = scmp.lt.s32.totalorder %s1543_s20, %s1594_s2 }
 0x16e   : > { %p1200_p7 = scmp.lt.s32.totalorder %s1198_s6, %s1194_s4 }
 0x16f   : > { %p1196_p2 = pnand %p1195_p5, %p1610_p3 }
 0x170   : > { %p1201_p4 = por %p1200_p7, %p1199_p6 }
 0x171   : > { %p1197_p1 = pneg %p1196_p2 }
 0x173   : > { %p1202_p8 = pnand %p1201_p4, %p1197_p1 }
 0x175   : > { %1205 = shalt.err (!%p1202_p8)
}
 0x176   : > { %s1255_s22 = smov 128   ;;  %s1256_s25 = smov 8  }
 0x177   : > { %1071 = dma.vmem_to_hbm [thread:$0]  (%p1610_p3), %s1545_s26, 8192, %s1543_s20, %s709_s13, %s1255_s22, %s1255_s22, %s1256_s25  }
 0x178 PF: > { %s737_s15 = sand.u32 1, %s1236_s9   ;;  %p1611_p11 = scmp.ne.s32.totalorder %s1600_s16, 0 }
 0x179   : > { %p1612_p9 = scmp.ge.s32.totalorder %s1248_s12, 2  ;;  %s738_s17 = scalar_lea.sflag [#allocation4], %s737_s15 }
 0x17b   : > { %p1082_p10 = pnand %p1612_p9, %p1611_p11 }
 0x17d   : > { %p1083_p12 = pneg %p1082_p10 }
 0x17f   : > { %1231 = dma.done.wait (%p1083_p12), %s738_s17, 8192  }
 0x180   : > { %1233 = vsyncadd (%p1083_p12), %s738_s17, 4294959104  ;;  %p16_p13 = scmp.ge.s32.totalorder %s1326_s21, 4   ;;  %s1613_s9 = smov %s1240_s10 }
 0x181   : > { %s1614_s10 = smov %s1244_s11  ;;  %s1615_s11 = smov %s1346_s29 }
 0x182   : > { %s1616_s12 = smov %s1326_s21  ;;  %18 = sbr.rel (!%p16_p13) target bundleno = 6 (0x6), region = 78 }
 0x187   :  { %743 = vsyncpa [#allocation3], 1 }
 0x188   :  { %745 = vsyncpa [#allocation3 + $0x1], 1 }
 0x189   :  { %746 = vsyncpa [#allocation6], 1 }
 0x18a   :  { %748 = vsyncpa [#allocation6 + $0x1], 1 }
 0x18b   :  { %749 = vsyncpa [#allocation4], 1 }
 0x18c   :  { %751 = vsyncpa [#allocation4 + $0x1], 1 }

</bundles_post_ra>
